<compile_context>
chip_gen: v5e
topology: v5e:2x2
jax: 0.10.0
libtpu: 0.0.40
codegen_flags: <defaults>
</compile_context>

<pallas_src>
import jax
import jax.numpy as jnp
from jax.experimental import pallas as pl
from jax.experimental.pallas import tpu as pltpu


_LANE = 128
_MAX_COLS = 8 * _LANE                 # lane-dense rows up to 1024 elements wide
_BLOCK_BYTES = 2 * 1024 * 1024        # ~2 MiB per block (safe on v5e/v6e/v7x)
_SUBLANE = {4: 8, 2: 16, 1: 32}       # itemsize -> sublane packing multiple


# ---------------------------------------------------------------------------
# Pallas copy kernel (the data-movement path of a view/reshape)
# ---------------------------------------------------------------------------
def _copy_kernel(x_ref, o_ref):
    o_ref[...] = x_ref[...]


def _pallas_copy_2d(x2d, block_rows):
    """Tiled VMEM copy of a (rows, cols) array; cols is a multiple of 128."""
    rows, cols = x2d.shape
    grid = (pl.cdiv(rows, block_rows),)   # partial last block handled by Pallas
    return pl.pallas_call(
        _copy_kernel,
        out_shape=jax.ShapeDtypeStruct((rows, cols), x2d.dtype),
        grid_spec=pltpu.PrefetchScalarGridSpec(
            num_scalar_prefetch=0,
            grid=grid,
            in_specs=[pl.BlockSpec((block_rows, cols), lambda i: (i, 0))],
            out_specs=pl.BlockSpec((block_rows, cols), lambda i: (i, 0)),
        ),
        compiler_params=pltpu.CompilerParams(
            dimension_semantics=("parallel",),   # megacore sharding on v7x
        ),
    )(x2d)


def _pick_layout(total, itemsize):
    """Choose a pad-free (rows, cols, block_rows) factorization of `total`."""
    if total % _LANE != 0:
        return None
    # Widest lane-dense column count (multiple of 128, <= 1024) dividing total.
    cols = _LANE
    for c in range(_MAX_COLS, _LANE - 1, -_LANE):
        if total % c == 0:
            cols = c
            break
    rows = total // cols
    sub = _SUBLANE.get(itemsize, 8)
    # ~2 MiB blocks, rounded down to the dtype's sublane multiple.
    target_rows = max(sub, (_BLOCK_BYTES // (cols * itemsize)) // sub * sub)
    block_rows = min(rows, target_rows)   # == rows (full dim) or multiple of sub
    return rows, cols, block_rows


# ---------------------------------------------------------------------------
# View module equivalent
# ---------------------------------------------------------------------------
class View:
    """JAX/Pallas equivalent of the PyTorch `View` module."""

    def __init__(self, shape):
        self.shape = tuple(shape)
        self._forward = jax.jit(self._impl)

    def _impl(self, x):
        out_shape = (-1,) + self.shape
        total = x.size
        itemsize = jnp.dtype(x.dtype).itemsize
        layout = _pick_layout(total, itemsize)
        if layout is None:
            # Element count not a multiple of 128 lanes: a view is metadata-only,
            # so return the zero-traffic reshape directly.
            return x.reshape(out_shape)
        rows, cols, block_rows = layout
        x2d = x.reshape(rows, cols)            # metadata-only under jit
        y2d = _pallas_copy_2d(x2d, block_rows)
        return y2d.reshape(out_shape)          # metadata-only under jit

    def __call__(self, x):
        return self._forward(x)


if __name__ == "__main__":
    key = jax.random.PRNGKey(0)

    # Case 1: small NCHW conv-style tensor (2, 4, 16, 16) -> (-1, 16, 64)
    x = jax.random.normal(key, (2, 4, 16, 16), dtype=jnp.float32)
    view = View((16, 64))
    out = jax.block_until_ready(view(x))
    expected = x.reshape((-1, 16, 64))
    assert out.shape == expected.shape, (out.shape, expected.shape)
    assert out.dtype == expected.dtype
    assert bool(jnp.all(out == expected))

    # Case 2: bf16 tensor exercising the multi-block grid + partial last block
    x2 = jax.random.normal(jax.random.PRNGKey(1), (9, 8, 128, 128),
                           dtype=jnp.bfloat16)
    view2 = View((128, 128))
    out2 = jax.block_until_ready(view2(x2))
    expected2 = x2.reshape((-1, 128, 128))
    assert out2.shape == expected2.shape, (out2.shape, expected2.shape)
    assert out2.dtype == expected2.dtype
    assert bool(jnp.all(out2 == expected2))

    print("KERNEL_OK")
</pallas_src>

<mosaic_0001>
module attributes {stable_mosaic.version = 11 : i64} {
  func.func @_copy_kernel(%arg0: i32, %arg1: memref<2x1024xf32, #tpu.memory_space<vmem>>, %arg2: memref<2x1024xf32, #tpu.memory_space<vmem>>) attributes {dimension_semantics = [#tpu.dimension_semantics<parallel>], iteration_bounds = array<i64: 1>, scalar_prefetch = 0 : i64, scratch_operands = 0 : i64, tpu.core_type = #tpu.core_type<tc>, window_params = [{transform_indices = @transform_0, window_bounds = array<i64: 2, 1024>}, {transform_indices = @transform_1, window_bounds = array<i64: 2, 1024>}]} {
    %c0 = arith.constant 0 : index
    %c0_0 = arith.constant 0 : index
    %0 = vector.load %arg1[%c0, %c0_0] : memref<2x1024xf32, #tpu.memory_space<vmem>>, vector<2x1024xf32>
    %c0_1 = arith.constant 0 : index
    %c0_2 = arith.constant 0 : index
    %1 = vector.load %arg2[%c0_1, %c0_2] : memref<2x1024xf32, #tpu.memory_space<vmem>>, vector<2x1024xf32>
    tpu.vector_store %arg2[%c0_1, %c0_2], %0 {strides = array<i32>} : memref<2x1024xf32, #tpu.memory_space<vmem>>, vector<2x1024xf32>,
    return
  }
  func.func @transform_0(%arg0: i32) -> (i32, i32) {
    %c0_i32 = arith.constant 0 : i32
    %c0_i32_0 = arith.constant 0 : i32
    return %arg0, %c0_i32 : i32, i32
  }
  func.func @transform_1(%arg0: i32) -> (i32, i32) {
    %c0_i32 = arith.constant 0 : i32
    %c0_i32_0 = arith.constant 0 : i32
    return %arg0, %c0_i32 : i32, i32
  }
}

</mosaic_0001>

<bundles_post_ra>
// kernel: _impl.1
= control target key start
LH: loop header
LB: loop body
LE: loop exit
PB: predicated region body
PF: predicated region fallthrough
CT: control target
= control target key end

     0   :  { %s38_s0 = inlined_call_operand.vmem [shape: f32[2,1024], index: 0, kind: input, shape index: {}]   ;;  %s39_s1 = inlined_call_operand.vmem [shape: f32[2,1024], index: 1, kind: output, shape index: {}]  }
   0x1   :  { %v8_v0 = vld [vmem:[%s38_s0] sm:$0xff]  ;;  %v9_v1 = vld [vmem:[%s38_s0 + $0x8] sm:$0xff] }
   0x2   :  { %10 = vst [vmem:[%s39_s1] sm:$0xff] %v8_v0 }
   0x3   :  { %11 = vst [vmem:[%s39_s1 + $0x8] sm:$0xff] %v9_v1 }

</bundles_post_ra>
